<compile_context>
chip_gen: v6e
topology: v6e:2x2x1
jax: 0.10.0
libtpu: 0.0.40
codegen_flags: <defaults>
</compile_context>

<pallas_src>
import functools

import jax
import jax.numpy as jnp
from jax.experimental import pallas as pl
from jax.experimental.pallas import tpu as pltpu

LEAKY_SLOPE = 0.01  # nn.LeakyReLU default negative_slope
BN_EPS = 1e-5
_LANE = 128
_SUBLANE = 8


def _leaky(h):
    # Identical to leaky_relu for 0 < slope < 1; single VALU op.
    return jnp.maximum(h, LEAKY_SLOPE * h)


# ---------------------------------------------------------------------------
# Kernels (channels-on-sublanes, spatial-on-lanes)
# ---------------------------------------------------------------------------
def pred_default_kernel(x_ref, w1_ref, t1_ref, w2_ref, t2_ref, o_ref):
    """[W1'@X + t1] -> LeakyReLU -> [W2'@h + t2] -> LeakyReLU  (Dropout = id)."""
    # x_ref: (C_in, T); w*_ref: (C_out, C_*); t*_ref: (C_out, 1)
    h = jnp.dot(w1_ref[...], x_ref[...], preferred_element_type=jnp.float32)
    h = _leaky(h + t1_ref[...].astype(jnp.float32))
    h = jnp.dot(w2_ref[...], h.astype(w2_ref.dtype),
                preferred_element_type=jnp.float32)
    h = _leaky(h + t2_ref[...].astype(jnp.float32))
    o_ref[...] = h.astype(o_ref.dtype)


def pred_npoints_kernel(x_ref, w1_ref, t1_ref, w2_ref, b2_ref,
                        w3_ref, b3_ref, o_ref):
    """conv1x1+BN -> LeakyReLU -> conv1x1 -> LeakyReLU -> conv1x1 -> Tanh."""
    h = jnp.dot(w1_ref[...], x_ref[...], preferred_element_type=jnp.float32)
    h = _leaky(h + t1_ref[...].astype(jnp.float32))
    h = jnp.dot(w2_ref[...], h.astype(w2_ref.dtype),
                preferred_element_type=jnp.float32)
    h = _leaky(h + b2_ref[...].astype(jnp.float32))
    h = jnp.dot(w3_ref[...], h.astype(w3_ref.dtype),
                preferred_element_type=jnp.float32)
    h = jnp.tanh(h + b3_ref[...].astype(jnp.float32))
    o_ref[...] = h.astype(o_ref.dtype)


# ---------------------------------------------------------------------------
# Tiling helpers
# ---------------------------------------------------------------------------
def _ceil_div(a, b):
    return -(-a // b)


def _round_up(a, b):
    return _ceil_div(a, b) * b


def _nbytes(*arrs):
    return int(sum(a.size * a.dtype.itemsize for a in arrs))


@functools.lru_cache(maxsize=1)
def _vmem_capacity_bytes():
    try:
        info = pltpu.get_tpu_info()
        for name in ("vmem_capacity_bytes", "vmem_size_bytes", "vmem_bytes",
                     "vmem_capacity"):
            v = getattr(info, name, None)
            if v:
                return int(v)
    except Exception:
        pass
    return 64 << 20  # conservative: v7x per-TensorCore VMEM


def _choose_spatial_tiling(hw, n_batch, per_lane_bytes, fixed_bytes):
    """Pick (tile_lanes, padded_hw, n_tiles): tile is a multiple of 128, tiles
    exactly cover padded_hw, size bounded by the per-generation VMEM budget."""
    padded = _round_up(hw, _LANE)
    budget = int(_vmem_capacity_bytes() * 0.6) - fixed_bytes - (2 << 20)
    budget = max(budget, per_lane_bytes * _LANE)
    lanes_cap = (budget // per_lane_bytes) // _LANE * _LANE
    lanes_cap = max(_LANE, min(32768, lanes_cap))
    n_tiles = _ceil_div(padded, lanes_cap)
    if n_batch == 1 and n_tiles == 1 and padded >= 2 * _LANE:
        n_tiles = 2  # keep both v7x TensorCores busy when batch == 1
    thw = _round_up(_ceil_div(padded, n_tiles), _LANE)
    padded = thw * n_tiles
    return thw, padded, n_tiles


def _vmem_limit(per_lane_bytes, thw, fixed_bytes):
    need = per_lane_bytes * thw + fixed_bytes + (4 << 20)
    cap = _vmem_capacity_bytes()
    return int(min(cap - (2 << 20), max(32 << 20, need)))


def _param_spec(shape):
    # whole-array block, same block for every grid point (fetched once)
    return pl.BlockSpec(shape, lambda b, j: (0, 0))


# ---------------------------------------------------------------------------
# Wrappers
# ---------------------------------------------------------------------------
@jax.jit
def pred_forward(x_nchw, params):
    """Default branch (n_points=None). params = (w1f, t1, w2f, t2) folded."""
    w1, t1, w2, t2 = params
    n, c_in, h, w = x_nchw.shape
    hw = h * w
    c_out = w1.shape[0]

    # bf16 activations -> bf16 weights -> native bf16 MXU path (f32 accumulate).
    w1 = w1.astype(x_nchw.dtype)
    w2 = w2.astype(x_nchw.dtype)

    isz = x_nchw.dtype.itemsize
    per_lane = 2 * c_in * isz + 2 * c_out * isz + 2 * c_out * 4
    fixed = 2 * _nbytes(w1, t1, w2, t2)
    thw, padded_hw, n_hw_tiles = _choose_spatial_tiling(hw, n, per_lane, fixed)

    x3 = x_nchw.reshape(n, c_in, hw)  # NCHW is already lane-dense; no transpose
    if padded_hw != hw:
        x3 = jnp.pad(x3, ((0, 0), (0, 0), (0, padded_hw - hw)))

    grid = (n, n_hw_tiles)
    flops = 2 * n * padded_hw * (c_in * c_out + c_out * c_out)
    bytes_accessed = _nbytes(x3, w1, t1, w2, t2) + n * c_out * padded_hw * isz

    out3 = pl.pallas_call(
        pred_default_kernel,
        out_shape=jax.ShapeDtypeStruct((n, c_out, padded_hw), x3.dtype),
        grid_spec=pltpu.PrefetchScalarGridSpec(
            num_scalar_prefetch=0,
            grid=grid,
            in_specs=[
                pl.BlockSpec((None, c_in, thw), lambda b, j: (b, 0, j)),
                _param_spec(w1.shape), _param_spec(t1.shape),
                _param_spec(w2.shape), _param_spec(t2.shape),
            ],
            out_specs=pl.BlockSpec((None, c_out, thw), lambda b, j: (b, 0, j)),
        ),
        compiler_params=pltpu.CompilerParams(
            dimension_semantics=("parallel", "parallel"),
            vmem_limit_bytes=_vmem_limit(per_lane, thw, fixed)),
        cost_estimate=pl.CostEstimate(flops=int(flops), transcendentals=0,
                                      bytes_accessed=int(bytes_accessed)),
    )(x3, w1, t1, w2, t2)

    if padded_hw != hw:
        out3 = out3[:, :, :hw]
    return out3.reshape(n, c_out, h, w)


@jax.jit
def pred_forward_npoints(x_nchw, params):
    """n_points branch. params = (w1f, t1, w2, b2, w3, b3)."""
    w1, t1, w2, b2, w3, b3 = params
    n, c_in, h, w = x_nchw.shape
    hw = h * w
    c_out = w1.shape[0]
    n_points = w3.shape[0]

    w1 = w1.astype(x_nchw.dtype)
    w2 = w2.astype(x_nchw.dtype)
    w3 = w3.astype(x_nchw.dtype)

    # Pad n_points to the 8-sublane boundary: full-width stores, fuller MXU M.
    npp = _round_up(n_points, _SUBLANE)
    if npp != n_points:
        w3 = jnp.pad(w3, ((0, npp - n_points), (0, 0)))
        b3 = jnp.pad(b3, ((0, npp - n_points), (0, 0)))

    isz = x_nchw.dtype.itemsize
    per_lane = 2 * c_in * isz + 2 * npp * isz + 3 * c_out * 4 + npp * 4
    fixed = 2 * _nbytes(w1, t1, w2, b2, w3, b3)
    thw, padded_hw, n_hw_tiles = _choose_spatial_tiling(hw, n, per_lane, fixed)

    x3 = x_nchw.reshape(n, c_in, hw)
    if padded_hw != hw:
        x3 = jnp.pad(x3, ((0, 0), (0, 0), (0, padded_hw - hw)))

    grid = (n, n_hw_tiles)
    flops = 2 * n * padded_hw * (c_in * c_out + c_out * c_out + c_out * npp)
    bytes_accessed = (_nbytes(x3, w1, t1, w2, b2, w3, b3)
                      + n * npp * padded_hw * isz)

    out3 = pl.pallas_call(
        pred_npoints_kernel,
        out_shape=jax.ShapeDtypeStruct((n, npp, padded_hw), x3.dtype),
        grid_spec=pltpu.PrefetchScalarGridSpec(
            num_scalar_prefetch=0,
            grid=grid,
            in_specs=[
                pl.BlockSpec((None, c_in, thw), lambda b, j: (b, 0, j)),
                _param_spec(w1.shape), _param_spec(t1.shape),
                _param_spec(w2.shape), _param_spec(b2.shape),
                _param_spec(w3.shape), _param_spec(b3.shape),
            ],
            out_specs=pl.BlockSpec((None, npp, thw), lambda b, j: (b, 0, j)),
        ),
        compiler_params=pltpu.CompilerParams(
            dimension_semantics=("parallel", "parallel"),
            vmem_limit_bytes=_vmem_limit(per_lane, thw, fixed)),
        cost_estimate=pl.CostEstimate(flops=int(flops),
                                      transcendentals=int(n * padded_hw * npp),
                                      bytes_accessed=int(bytes_accessed)),
    )(x3, w1, t1, w2, b2, w3, b3)

    out3 = out3[:, :n_points, :hw]
    return out3.reshape(n, n_points, h, w)


# ---------------------------------------------------------------------------
# Parameter construction & host-side folding (inference BN)
# ---------------------------------------------------------------------------
def _fold_conv_bn(w, b, gamma, beta, mean, var):
    """BN(Wx + b) = (s*W) x + (s*(b - mean) + beta),  s = gamma/sqrt(var+eps)."""
    s = gamma / jnp.sqrt(var + BN_EPS)
    w_f = w * s[:, None]                       # (C_out, C_in), row-scaled
    shift = (s * (b - mean) + beta)[:, None]   # (C_out, 1)
    return w_f.astype(jnp.float32), shift.astype(jnp.float32)


def make_raw_default(key, c_in, c_out):
    ks = jax.random.split(key, 12)
    w1 = 0.1 * jax.random.normal(ks[0], (c_out, c_in), jnp.float32)
    b1 = 0.1 * jax.random.normal(ks[1], (c_out,), jnp.float32)
    g1 = 1.0 + 0.1 * jax.random.normal(ks[2], (c_out,), jnp.float32)
    be1 = 0.1 * jax.random.normal(ks[3], (c_out,), jnp.float32)
    m1 = 0.1 * jax.random.normal(ks[4], (c_out,), jnp.float32)
    v1 = jnp.abs(jax.random.normal(ks[5], (c_out,), jnp.float32)) + 0.5
    w2 = 0.1 * jax.random.normal(ks[6], (c_out, c_out), jnp.float32)
    b2 = 0.1 * jax.random.normal(ks[7], (c_out,), jnp.float32)
    g2 = 1.0 + 0.1 * jax.random.normal(ks[8], (c_out,), jnp.float32)
    be2 = 0.1 * jax.random.normal(ks[9], (c_out,), jnp.float32)
    m2 = 0.1 * jax.random.normal(ks[10], (c_out,), jnp.float32)
    v2 = jnp.abs(jax.random.normal(ks[11], (c_out,), jnp.float32)) + 0.5
    return (w1, b1, g1, be1, m1, v1, w2, b2, g2, be2, m2, v2)


def fold_default(raw):
    w1, b1, g1, be1, m1, v1, w2, b2, g2, be2, m2, v2 = raw
    wf1, t1 = _fold_conv_bn(w1, b1, g1, be1, m1, v1)
    wf2, t2 = _fold_conv_bn(w2, b2, g2, be2, m2, v2)
    return (wf1, t1, wf2, t2)


def make_raw_npoints(key, c_in, c_out, n_points):
    ks = jax.random.split(key, 10)
    w1 = 0.1 * jax.random.normal(ks[0], (c_out, c_in), jnp.float32)
    b1 = 0.1 * jax.random.normal(ks[1], (c_out,), jnp.float32)
    g1 = 1.0 + 0.1 * jax.random.normal(ks[2], (c_out,), jnp.float32)
    be1 = 0.1 * jax.random.normal(ks[3], (c_out,), jnp.float32)
    m1 = 0.1 * jax.random.normal(ks[4], (c_out,), jnp.float32)
    v1 = jnp.abs(jax.random.normal(ks[5], (c_out,), jnp.float32)) + 0.5
    w2 = 0.1 * jax.random.normal(ks[6], (c_out, c_out), jnp.float32)
    b2 = 0.1 * jax.random.normal(ks[7], (c_out,), jnp.float32)
    w3 = 0.1 * jax.random.normal(ks[8], (n_points, c_out), jnp.float32)
    b3 = 0.1 * jax.random.normal(ks[9], (n_points,), jnp.float32)
    return (w1, b1, g1, be1, m1, v1, w2, b2, w3, b3)


def fold_npoints(raw):
    w1, b1, g1, be1, m1, v1, w2, b2, w3, b3 = raw
    wf1, t1 = _fold_conv_bn(w1, b1, g1, be1, m1, v1)
    return (wf1, t1, w2, b2[:, None], w3, b3[:, None])


# ---------------------------------------------------------------------------
# Pure-JAX references (un-folded, PyTorch-order math) for verification
# ---------------------------------------------------------------------------
def _leaky_ref(h):
    return jnp.where(h > 0, h, LEAKY_SLOPE * h)


def ref_default(x, raw):
    w1, b1, g1, be1, m1, v1, w2, b2, g2, be2, m2, v2 = raw

    def conv_bn_lrelu(x, w, b, g, be, m, v):
        y = jnp.einsum('oi,nihw->nohw', w, x) + b[None, :, None, None]
        s = g / jnp.sqrt(v + BN_EPS)
        y = y * s[None, :, None, None] + (be - m * s)[None, :, None, None]
        return _leaky_ref(y)

    h = conv_bn_lrelu(x, w1, b1, g1, be1, m1, v1)
    return conv_bn_lrelu(h, w2, b2, g2, be2, m2, v2)


def ref_npoints(x, raw):
    w1, b1, g1, be1, m1, v1, w2, b2, w3, b3 = raw
    s = g1 / jnp.sqrt(v1 + BN_EPS)
    h = jnp.einsum('oi,nihw->nohw', w1, x) + b1[None, :, None, None]
    h = _leaky_ref(h * s[None, :, None, None] + (be1 - m1 * s)[None, :, None, None])
    h = _leaky_ref(jnp.einsum('oi,nihw->nohw', w2, h) + b2[None, :, None, None])
    return jnp.tanh(jnp.einsum('oi,nihw->nohw', w3, h) + b3[None, :, None, None])


if __name__ == "__main__":
    key = jax.random.PRNGKey(0)
    k_x, k_x2, k_p1, k_p2 = jax.random.split(key, 4)

    # Small shapes consistent with the module: NCHW input.
    N, C_IN, C_OUT = 2, 8, 16
    N_POINTS = 4

    # --- Default branch (n_points=None), f32, even spatial --------------------
    H, W = 16, 16
    x = jax.random.normal(k_x, (N, C_IN, H, W), jnp.float32)
    raw_d = make_raw_default(k_p1, C_IN, C_OUT)
    fold_d = fold_default(raw_d)
    out_d = jax.block_until_ready(pred_forward(x, fold_d))
    assert out_d.shape == (N, C_OUT, H, W)
    ref_d = ref_default(x, raw_d)
    assert jnp.allclose(out_d, ref_d, atol=1e-4, rtol=1e-4)

    # --- Default branch, bf16 I/O (native bf16 MXU path) ----------------------
    x_bf16 = x.astype(jnp.bfloat16)
    out_bf16 = jax.block_until_ready(pred_forward(x_bf16, fold_d))
    assert out_bf16.dtype == jnp.bfloat16
    ref_bf16 = ref_default(x_bf16.astype(jnp.float32), raw_d)
    assert jnp.allclose(out_bf16.astype(jnp.float32), ref_bf16,
                        atol=5e-2, rtol=5e-2)

    # --- n_points branch, ragged spatial (exercises hw + n_points padding) ----
    H2, W2 = 17, 17
    x2 = jax.random.normal(k_x2, (N, C_IN, H2, W2), jnp.float32)
    raw_n = make_raw_npoints(k_p2, C_IN, C_OUT, N_POINTS)
    out_n = jax.block_until_ready(pred_forward_npoints(x2, fold_npoints(raw_n)))
    assert out_n.shape == (N, N_POINTS, H2, W2)
    ref_n = ref_npoints(x2, raw_n)
    assert jnp.allclose(out_n, ref_n, atol=1e-4, rtol=1e-4)

    print("KERNEL_OK")
</pallas_src>

<mosaic_0001>
module attributes {stable_mosaic.version = 11 : i64} {
  func.func @pred_default_kernel(%arg0: i32, %arg1: i32, %arg2: memref<1x8x256xf32, #tpu.memory_space<vmem>>, %arg3: memref<16x8xf32, #tpu.memory_space<vmem>>, %arg4: memref<16x1xf32, #tpu.memory_space<vmem>>, %arg5: memref<16x16xf32, #tpu.memory_space<vmem>>, %arg6: memref<16x1xf32, #tpu.memory_space<vmem>>, %arg7: memref<1x16x256xf32, #tpu.memory_space<vmem>>) attributes {dimension_semantics = [#tpu.dimension_semantics<parallel>, #tpu.dimension_semantics<parallel>], iteration_bounds = array<i64: 2, 1>, scalar_prefetch = 0 : i64, scratch_operands = 0 : i64, tpu.core_type = #tpu.core_type<tc>, window_params = [{transform_indices = @transform_0, window_bounds = array<i64: 1, 8, 256>}, {pipeline_mode = #tpu.pipeline_mode<synchronous>, transform_indices = @transform_1, window_bounds = array<i64: 16, 8>}, {pipeline_mode = #tpu.pipeline_mode<synchronous>, transform_indices = @transform_2, window_bounds = array<i64: 16, 1>}, {pipeline_mode = #tpu.pipeline_mode<synchronous>, transform_indices = @transform_3, window_bounds = array<i64: 16, 16>}, {pipeline_mode = #tpu.pipeline_mode<synchronous>, transform_indices = @transform_4, window_bounds = array<i64: 16, 1>}, {transform_indices = @transform_5, window_bounds = array<i64: 1, 16, 256>}]} {
    %c0 = arith.constant 0 : index
    %c0_0 = arith.constant 0 : index
    %0 = vector.load %arg3[%c0, %c0_0] : memref<16x8xf32, #tpu.memory_space<vmem>>, vector<16x8xf32>
    %c0_1 = arith.constant 0 : index
    %c0_2 = arith.constant 0 : index
    %c0_3 = arith.constant 0 : index
    %1 = vector.load %arg2[%c0_1, %c0_2, %c0_3] : memref<1x8x256xf32, #tpu.memory_space<vmem>>, vector<1x8x256xf32>
    %2 = vector.shape_cast %1 : vector<1x8x256xf32> to vector<8x256xf32>
    %cst = arith.constant dense<0.000000e+00> : vector<16x256xf32>
    %3 = tpu.matmul %0, %2, %cst {dimension_numbers = #tpu.dot_dimension_numbers<[1], [0], [0], [1], [0, 0, 1, 1], [], []>} : vector<16x8xf32>, vector<8x256xf32>, vector<16x256xf32> -> vector<16x256xf32>
    %c0_4 = arith.constant 0 : index
    %c0_5 = arith.constant 0 : index
    %4 = vector.load %arg4[%c0_4, %c0_5] : memref<16x1xf32, #tpu.memory_space<vmem>>, vector<16x1xf32>
    %5 = vector.broadcast %4 : vector<16x1xf32> to vector<16x256xf32>
    %6 = arith.addf %3, %5 : vector<16x256xf32>
    %cst_6 = arith.constant 0.00999999977 : f32
    %7 = vector.broadcast %cst_6 : f32 to vector<16x256xf32>
    %8 = arith.mulf %7, %6 : vector<16x256xf32>
    %9 = arith.maximumf %6, %8 : vector<16x256xf32>
    %c0_7 = arith.constant 0 : index
    %c0_8 = arith.constant 0 : index
    %10 = vector.load %arg5[%c0_7, %c0_8] : memref<16x16xf32, #tpu.memory_space<vmem>>, vector<16x16xf32>
    %cst_9 = arith.constant dense<0.000000e+00> : vector<16x256xf32>
    %11 = tpu.matmul %10, %9, %cst_9 {dimension_numbers = #tpu.dot_dimension_numbers<[1], [0], [0], [1], [0, 0, 1, 1], [], []>} : vector<16x16xf32>, vector<16x256xf32>, vector<16x256xf32> -> vector<16x256xf32>
    %c0_10 = arith.constant 0 : index
    %c0_11 = arith.constant 0 : index
    %12 = vector.load %arg6[%c0_10, %c0_11] : memref<16x1xf32, #tpu.memory_space<vmem>>, vector<16x1xf32>
    %13 = vector.broadcast %12 : vector<16x1xf32> to vector<16x256xf32>
    %14 = arith.addf %11, %13 : vector<16x256xf32>
    %cst_12 = arith.constant 0.00999999977 : f32
    %15 = vector.broadcast %cst_12 : f32 to vector<16x256xf32>
    %16 = arith.mulf %15, %14 : vector<16x256xf32>
    %17 = arith.maximumf %14, %16 : vector<16x256xf32>
    %c0_13 = arith.constant 0 : index
    %c0_14 = arith.constant 0 : index
    %c0_15 = arith.constant 0 : index
    %18 = vector.load %arg7[%c0_13, %c0_14, %c0_15] : memref<1x16x256xf32, #tpu.memory_space<vmem>>, vector<1x16x256xf32>
    %19 = vector.shape_cast %18 : vector<1x16x256xf32> to vector<16x256xf32>
    %20 = vector.shape_cast %17 : vector<16x256xf32> to vector<1x16x256xf32>
    tpu.vector_store %arg7[%c0_13, %c0_14, %c0_15], %20 {strides = array<i32>} : memref<1x16x256xf32, #tpu.memory_space<vmem>>, vector<1x16x256xf32>,
    return
  }
  func.func @transform_0(%arg0: i32, %arg1: i32) -> (i32, i32, i32) {
    %c0_i32 = arith.constant 0 : i32
    %c0_i32_0 = arith.constant 0 : i32
    return %arg0, %c0_i32, %arg1 : i32, i32, i32
  }
  func.func @transform_1(%arg0: i32, %arg1: i32) -> (i32, i32) {
    %c0_i32 = arith.constant 0 : i32
    %c0_i32_0 = arith.constant 0 : i32
    %c0_i32_1 = arith.constant 0 : i32
    return %c0_i32, %c0_i32_0 : i32, i32
  }
  func.func @transform_2(%arg0: i32, %arg1: i32) -> (i32, i32) {
    %c0_i32 = arith.constant 0 : i32
    %c0_i32_0 = arith.constant 0 : i32
    %c0_i32_1 = arith.constant 0 : i32
    return %c0_i32, %c0_i32_0 : i32, i32
  }
  func.func @transform_3(%arg0: i32, %arg1: i32) -> (i32, i32) {
    %c0_i32 = arith.constant 0 : i32
    %c0_i32_0 = arith.constant 0 : i32
    %c0_i32_1 = arith.constant 0 : i32
    return %c0_i32, %c0_i32_0 : i32, i32
  }
  func.func @transform_4(%arg0: i32, %arg1: i32) -> (i32, i32) {
    %c0_i32 = arith.constant 0 : i32
    %c0_i32_0 = arith.constant 0 : i32
    %c0_i32_1 = arith.constant 0 : i32
    return %c0_i32, %c0_i32_0 : i32, i32
  }
  func.func @transform_5(%arg0: i32, %arg1: i32) -> (i32, i32, i32) {
    %c0_i32 = arith.constant 0 : i32
    %c0_i32_0 = arith.constant 0 : i32
    return %arg0, %c0_i32, %arg1 : i32, i32, i32
  }
}

</mosaic_0001>

<bundles_post_ra>
// kernel: pred_forward.1
= control target key start
LH: loop header
LB: loop body
LE: loop exit
PB: predicated region body
PF: predicated region fallthrough
CT: control target
= control target key end

     0   :  { %s670_s18 = smov 0   ;;  %s672_s19 = smov 0   ;;  %s731_s0 = inlined_call_operand.vmem [shape: f32[2,8,256], index: 0, kind: input, shape index: {}]   ;;  %s732_s1 = inlined_call_operand.vmem [shape: f32[16,8], index: 1, kind: input, shape index: {}]   ;;  %s733_s2 = inlined_call_operand.vmem [shape: f32[16,1], index: 2, kind: input, shape index: {}]   ;;  %s734_s3 = inlined_call_operand.vmem [shape: f32[16,16], index: 3, kind: input, shape index: {}]   ;;  %s735_s4 = inlined_call_operand.vmem [shape: f32[16,1], index: 4, kind: input, shape index: {}]   ;;  %s736_s5 = inlined_call_operand.vmem [shape: f32[2,16,256], index: 5, kind: output, shape index: {}]  }
   0x1   :  { %s674_s20 = smov 0  }
   0x2 LB: > { %s27_s21 = sadd.s32 1, %s632_s19  ;;  %p573_p0 = scmp.ge.s32.totalorder %s636_s20, 1  ;;  %s636_s20 = sphi %s674_s20, %s15_s20   ;;  %s632_s19 = sphi %s672_s19, %s738_s19   ;;  %s628_s18 = sphi %s670_s18, %s737_s18  }
   0x3   : > { %p29_p1 = scmp.ge.s32.totalorder %s27_s21, 2  ;;  %p208_p2 = scmp.lt.s32.totalorder %s636_s20, 3 }
   0x5   : > { %s740_s21 = smov (%p29_p1, %s27_s21), 0  ;;  %p209_p3 = pnand %p573_p0, %p208_p2 }
   0x6   : > { %p245_p4 = scmp.lt.s32.totalorder (!%p209_p3), %s628_s18, 1 }
   0x7   : > { %212 = sbr.rel (%p209_p3) target bundleno = 433 (0x1b1), region = 40 }
   0xc   : > { %v638_v0 = vmov 0.0   ;;  %v639_v1 = vmov 0   ;;  %v269_v2 = vld [vmem:[%s733_s2 + $0x8] sm:$0xff]  ;;  %s742_s18 = smov (!%p245_p4, %s628_s18), 1  ;;  %v268_v3 = vld [vmem:[%s733_s2] sm:$0xff]  ;;  %vm280_vm0 = vcmask 64512  }
   0xd   : > { %351 = vmatprep.mubr.f32.mxu0 %v638_v0  ;;  %612 = vset.pattern.permute.xlu0 %v639_v1  ;;  %s584_s26 = sshll.u32 %s742_s18, 4  ;;  %v264_v6 = vld [vmem:[%s732_s1] sm:$0xff]  ;;  %v265_v7 = vld [vmem:[%s732_s1 + $0x8] sm:$0xff]  ;;  %vm386_vm1 = vcmask 130048   ;;  %s585_s17 = sshll.u32 %s742_s18, 5 }
   0xe   : > { %277 = vperm.xlu0 %612, %v269_v2   ;;  %457 = vmatprep.mubr.f32.mxu1 %v638_v0  ;;  %s252_s29 = scalar_lea.vmem %s731_s0, %s584_s26  ;;  %v374_v8 = vld [vmem:[%s735_s4] sm:$0xff]  ;;  %v375_v9 = vld [vmem:[%s735_s4 + $0x8] sm:$0xff]  ;;  %s262_s24 = scalar_lea.vmem %s736_s5, %s585_s17 }
   0xf   : > { %613 = vset.pattern.permute.xlu1 %v639_v1  ;;  %v267_v4 = vld [vmem:[%s252_s29 + $0x8] sm:$0xff]  ;;  %v266_v5 = vld [vmem:[%s252_s29] sm:$0xff] }
  0x10   : > { %317 = vmatprep.subr.mxu0 %v267_v4  ;;  %378 = vperm.xlu1 %613, %v374_v8   ;;  %v372_v28 = vld [vmem:[%s734_s3] sm:$0xff]  ;;  %v373_v29 = vld [vmem:[%s734_s3 + $0x8] sm:$0xff] }
  0x11   : > { %318 = vmatpush1.msra.mxu0 %v266_v5 }
  0x12   : > { %272 = vperm.xlu0 %612, %v268_v3   ;;  %578 = vmatmul.mubr.msk.f32.vlgmr.msra.gmra.mxu0 %vm280_vm0, %v264_v6 }
  0x13   : > { %357 = vmatprep.mubr.f32.mxu0 %v638_v0 }
  0x14   : > { %383 = vperm.xlu1 %613, %v375_v9  }
  0x16   : > { %579 = vmatmul.mubr.msk.f32.gmra.mxu0 %vm280_vm0, %v265_v7 }
  0x89   : > { %v278_v10 = vpop.permute.xlu0 %277 }
  0x8b   : > { %v379_v30 = vpop.permute.xlu1 %378 }
  0x8d   : > { %v273_v13 = vpop.permute.xlu0 %272 }
  0x8f   : > { %v384_v36 = vpop.permute.xlu1 %383 }
  0xd2   : > { %v353_v11 = vpop.f32.mrf.mxu0 }
  0xd3   : > { %v354_v17 = vadd.f32 %v353_v11, %v273_v13 }
  0xd4   : > { %v355_v12 = vpop.f32.mrf.mxu0 }
  0xd5   : > { %v356_v15 = vadd.f32 %v355_v12, %v273_v13  ;;  %v364_v23 = vmul.f32 0.01, %v354_v17 }
  0xd6   : > { %v359_v14 = vpop.f32.mrf.mxu0 }
  0xd7   : > { %v360_v16 = vadd.f32 %v359_v14, %v278_v10  ;;  %v365_v21 = vmul.f32 0.01, %v356_v15  ;;  %v368_v27 = vmax.f32 %v354_v17, %v364_v23 }
  0xd8   : > { %v361_v18 = vpop.f32.mrf.mxu0 }
  0xd9   : > { %v362_v19 = vadd.f32 %v361_v18, %v278_v10  ;;  %v366_v20 = vmul.f32 0.01, %v360_v16  ;;  %v369_v26 = vmax.f32 %v356_v15, %v365_v21 }
  0xdb   : > { %v367_v22 = vmul.f32 0.01, %v362_v19  ;;  %v370_v25 = vmax.f32 %v360_v16, %v366_v20 }
  0xdd   : > { %v371_v24 = vmax.f32 %v362_v19, %v367_v22 }
  0xdf   : > { %421 = vmatprep.subr.mxu1 %v371_v24 }
  0xe0   : > { %422 = vmatpush1.msra.mxu1 %v370_v25 }
  0xe1   : > { %423 = vmatprep.subr.mxu1 %v369_v26 }
  0xe2   : > { %424 = vmatpush1.msra.mxu1 %v368_v27 }
  0xe3   : > { %580 = vmatmul.mubr.msk.f32.vlgmr.msra.gmra.mxu1 %vm386_vm1, %v372_v28 }
  0xe4   : > { %463 = vmatprep.mubr.f32.mxu1 %v638_v0 }
  0xe7   : > { %581 = vmatmul.mubr.msk.f32.gmra.mxu1 %vm386_vm1, %v373_v29 }
 0x1a3   : > { %v459_v31 = vpop.f32.mrf.mxu1 }
 0x1a4   : > { %v460_v32 = vadd.f32 %v459_v31, %v379_v30 }
 0x1a5   : > { %v461_v33 = vpop.f32.mrf.mxu1 }
 0x1a6   : > { %v470_v34 = vmul.f32 0.01, %v460_v32  ;;  %v462_v35 = vadd.f32 %v461_v33, %v379_v30 }
 0x1a7   : > { %v465_v37 = vpop.f32.mrf.mxu1 }
 0x1a8   : > { %v474_v38 = vmax.f32 %v460_v32, %v470_v34  ;;  %v471_v39 = vmul.f32 0.01, %v462_v35  ;;  %v466_v40 = vadd.f32 %v465_v37, %v384_v36 }
 0x1a9   : > { %v467_v41 = vpop.f32.mrf.mxu1 }
 0x1aa   : > { %478 = vst [vmem:[%s262_s24] sm:$0xff] %v474_v38  ;;  %v475_v42 = vmax.f32 %v462_v35, %v471_v39  ;;  %v472_v43 = vmul.f32 0.01, %v466_v40  ;;  %v468_v44 = vadd.f32 %v467_v41, %v384_v36 }
 0x1ac   : > { %479 = vst [vmem:[%s262_s24 + $0x8] sm:$0xff] %v475_v42  ;;  %v476_v45 = vmax.f32 %v466_v40, %v472_v43  ;;  %v473_v46 = vmul.f32 0.01, %v468_v44 }
 0x1ae   : > { %480 = vst [vmem:[%s262_s24 + $0x10] sm:$0xff] %v476_v45  ;;  %v477_v47 = vmax.f32 %v468_v44, %v473_v46 }
 0x1b0   : > { %481 = vst [vmem:[%s262_s24 + $0x18] sm:$0xff] %v477_v47 }
 0x1b1 PF: > { %s15_s20 = sadd.s32 1, %s636_s20   ;;  %s737_s18 = smov %s632_s19 }
 0x1b2   : > { %p12_p5 = scmp.ge.s32.totalorder %s15_s20, 4   ;;  %s738_s19 = smov %s740_s21 }
 0x1b4   :  { %14 = sbr.rel (!%p12_p5) target bundleno = 2 (0x2), region = 70 }

</bundles_post_ra>
